<compile_context>
chip_gen: v7x
topology: tpu7x:2x2x1
jax: 0.10.0
libtpu: 0.0.40
codegen_flags: <defaults>
</compile_context>

<pallas_src>
import jax
import jax.numpy as jnp
from jax.experimental import pallas as pl
from jax.experimental.pallas import tpu as pltpu

IN_FEATURE = 8
NEURONS = 8
OUT_FEATURES = 2
LAYER_NUM = 5
OUT_COLS = OUT_FEATURES + 1  # [rg, 1, bg]


def _round_up(n, m):
    return ((n + m - 1) // m) * m


def pcc_kernel(xT_ref, w1_ref, b1_ref, wh_ref, bh_ref, wl_ref, bl_ref, oT_ref):
    # xT_ref: (IN_FEATURE, TB)                    -- batch on lanes
    # w1_ref: (NEURONS, IN_FEATURE)   b1_ref: (NEURONS, 1)
    # wh_ref: (LAYER_NUM, NEURONS, NEURONS)  bh_ref: (LAYER_NUM, NEURONS, 1)
    # wl_ref: (OUT_COLS, NEURONS)     bl_ref: (OUT_COLS, 1)   (ones column folded in)
    # oT_ref: (OUT_COLS, TB)
    h = jnp.dot(w1_ref[...], xT_ref[...],
                preferred_element_type=jnp.float32) + b1_ref[...]

    # 5 hidden layers, statically unrolled (tiny 8x8 matmuls), each + ReLU.
    for i in range(LAYER_NUM):
        h = jnp.dot(wh_ref[i], h, preferred_element_type=jnp.float32) + bh_ref[i]
        h = jnp.maximum(h, 0.0)

    # Augmented last layer writes the full lane-dense (3, TB) output slab.
    oT_ref[...] = jnp.dot(wl_ref[...], h,
                          preferred_element_type=jnp.float32) + bl_ref[...]


def pcc_forward(x, params, tb=2048):
    """x: (B, ...) flattened to (B, IN_FEATURE) like torch reshape(B, -1)."""
    w1, b1, wh, bh, wl, bl = params  # PyTorch (out, in) convention

    x2 = x.reshape(x.shape[0], -1).astype(jnp.float32)
    B = x2.shape[0]

    # Tile the batch; keep TB a multiple of 128 (lanes) and pad B up to it.
    tb = min(tb, _round_up(B, 128))
    B_pad = _round_up(B, tb)
    grid = (B_pad // tb,)

    xT = jnp.pad(x2, ((0, B_pad - B), (0, 0))).T  # (IN_FEATURE, B_pad)

    # Fold the constant-1 middle output column into the last layer.
    wl_aug = jnp.concatenate(
        [wl[0:1, :], jnp.zeros((1, NEURONS), jnp.float32), wl[1:2, :]], axis=0)
    bl_aug = jnp.concatenate(
        [bl[0:1], jnp.ones((1,), jnp.float32), bl[1:2]]).reshape(OUT_COLS, 1)

    b1_c = b1.reshape(NEURONS, 1)
    bh_c = bh.reshape(LAYER_NUM, NEURONS, 1)

    weight_bytes = 4 * (w1.size + b1_c.size + wh.size + bh_c.size
                        + wl_aug.size + bl_aug.size)
    cost = pl.CostEstimate(
        flops=2 * B_pad * (IN_FEATURE * NEURONS
                           + LAYER_NUM * NEURONS * NEURONS
                           + NEURONS * OUT_COLS),
        transcendentals=0,
        bytes_accessed=4 * B_pad * (IN_FEATURE + OUT_COLS) + weight_bytes,
    )

    const2 = lambda i: (0, 0)
    const3 = lambda i: (0, 0, 0)

    oT = pl.pallas_call(
        pcc_kernel,
        out_shape=jax.ShapeDtypeStruct((OUT_COLS, B_pad), jnp.float32),
        grid=grid,
        in_specs=[
            pl.BlockSpec((IN_FEATURE, tb), lambda i: (0, i)),        # x tile
            pl.BlockSpec((NEURONS, IN_FEATURE), const2),             # w1 (resident)
            pl.BlockSpec((NEURONS, 1), const2),                      # b1
            pl.BlockSpec((LAYER_NUM, NEURONS, NEURONS), const3),     # wh
            pl.BlockSpec((LAYER_NUM, NEURONS, 1), const3),           # bh
            pl.BlockSpec((OUT_COLS, NEURONS), const2),               # wl_aug
            pl.BlockSpec((OUT_COLS, 1), const2),                     # bl_aug
        ],
        out_specs=pl.BlockSpec((OUT_COLS, tb), lambda i: (0, i)),
        compiler_params=pltpu.CompilerParams(
            dimension_semantics=("parallel",)),
        cost_estimate=cost,
    )(xT, w1, b1_c, wh, bh_c, wl_aug, bl_aug)

    return oT[:, :B].T  # (B, 3) = [rg, 1, bg]


def init_params(key):
    """kaiming_uniform_ (fan_in, gain=sqrt(2)) on weights, zero biases.

    Weights use the PyTorch (out_features, in_features) convention.
    """
    def kaiming_uniform(k, shape):
        fan_in = shape[-1]
        bound = jnp.sqrt(6.0 / fan_in)  # gain*sqrt(3/fan_in) with gain=sqrt(2)
        return jax.random.uniform(k, shape, jnp.float32, -bound, bound)

    k1, k2, k3 = jax.random.split(key, 3)
    w1 = kaiming_uniform(k1, (NEURONS, IN_FEATURE))
    b1 = jnp.zeros((NEURONS,), jnp.float32)

    khs = jax.random.split(k2, LAYER_NUM)
    wh = jnp.stack([kaiming_uniform(khs[i], (NEURONS, NEURONS))
                    for i in range(LAYER_NUM)], axis=0)
    bh = jnp.zeros((LAYER_NUM, NEURONS), jnp.float32)

    wl = kaiming_uniform(k3, (OUT_FEATURES, NEURONS))
    bl = jnp.zeros((OUT_FEATURES,), jnp.float32)
    return (w1, b1, wh, bh, wl, bl)


def pcc_reference(x, params):
    """Pure-JAX reference of the PyTorch forward (PyTorch weight convention)."""
    w1, b1, wh, bh, wl, bl = params
    h = x.reshape(x.shape[0], -1).astype(jnp.float32) @ w1.T + b1[None, :]
    for i in range(LAYER_NUM):
        h = jnp.maximum(h @ wh[i].T + bh[i][None, :], 0.0)
    out = h @ wl.T + bl[None, :]
    rg, bg = out[:, 0:1], out[:, 1:]
    return jnp.concatenate([rg, jnp.ones_like(rg), bg], axis=-1)


if __name__ == "__main__":
    key = jax.random.PRNGKey(0)
    kx, kp, kx2 = jax.random.split(key, 3)
    params = init_params(kp)

    # Small batch, input shaped (B, 2, 4) -> flattened to (B, 8) like torch.
    x = jax.random.normal(kx, (4, 2, 4), jnp.float32)
    out = jax.block_until_ready(pcc_forward(x, params))
    ref = pcc_reference(x, params)
    assert out.shape == (4, OUT_COLS)
    assert jnp.allclose(out, ref, atol=1e-5, rtol=1e-5)

    # Larger batch: exercises the batch grid (>1 step) and padding path.
    x_big = jax.random.normal(kx2, (3000, IN_FEATURE), jnp.float32)
    out_big = jax.block_until_ready(pcc_forward(x_big, params, tb=1024))
    ref_big = pcc_reference(x_big, params)
    assert out_big.shape == (3000, OUT_COLS)
    assert jnp.allclose(out_big, ref_big, atol=1e-4, rtol=1e-4)

    print("KERNEL_OK")
</pallas_src>

<mosaic_0001>
module attributes {stable_mosaic.version = 11 : i64} {
  func.func @pcc_kernel(%arg0: i32, %arg1: memref<8x128xf32, #tpu.memory_space<vmem>>, %arg2: memref<8x8xf32, #tpu.memory_space<vmem>>, %arg3: memref<8x1xf32, #tpu.memory_space<vmem>>, %arg4: memref<5x8x8xf32, #tpu.memory_space<vmem>>, %arg5: memref<5x8x1xf32, #tpu.memory_space<vmem>>, %arg6: memref<3x8xf32, #tpu.memory_space<vmem>>, %arg7: memref<3x1xf32, #tpu.memory_space<vmem>>, %arg8: memref<3x128xf32, #tpu.memory_space<vmem>>) attributes {dimension_semantics = [#tpu.dimension_semantics<parallel>], iteration_bounds = array<i64: 1>, scalar_prefetch = 0 : i64, scratch_operands = 0 : i64, tpu.core_type = #tpu.core_type<tc>, window_params = [{transform_indices = @transform_0, window_bounds = array<i64: 8, 128>}, {pipeline_mode = #tpu.pipeline_mode<synchronous>, transform_indices = @transform_1, window_bounds = array<i64: 8, 8>}, {pipeline_mode = #tpu.pipeline_mode<synchronous>, transform_indices = @transform_2, window_bounds = array<i64: 8, 1>}, {pipeline_mode = #tpu.pipeline_mode<synchronous>, transform_indices = @transform_3, window_bounds = array<i64: 5, 8, 8>}, {pipeline_mode = #tpu.pipeline_mode<synchronous>, transform_indices = @transform_4, window_bounds = array<i64: 5, 8, 1>}, {pipeline_mode = #tpu.pipeline_mode<synchronous>, transform_indices = @transform_5, window_bounds = array<i64: 3, 8>}, {pipeline_mode = #tpu.pipeline_mode<synchronous>, transform_indices = @transform_6, window_bounds = array<i64: 3, 1>}, {transform_indices = @transform_7, window_bounds = array<i64: 3, 128>}]} {
    %c0 = arith.constant 0 : index
    %c0_0 = arith.constant 0 : index
    %0 = vector.load %arg2[%c0, %c0_0] : memref<8x8xf32, #tpu.memory_space<vmem>>, vector<8x8xf32>
    %c0_1 = arith.constant 0 : index
    %c0_2 = arith.constant 0 : index
    %1 = vector.load %arg1[%c0_1, %c0_2] : memref<8x128xf32, #tpu.memory_space<vmem>>, vector<8x128xf32>
    %cst = arith.constant dense<0.000000e+00> : vector<8x128xf32>
    %2 = tpu.matmul %0, %1, %cst {dimension_numbers = #tpu.dot_dimension_numbers<[1], [0], [0], [1], [0, 0, 1, 1], [], []>} : vector<8x8xf32>, vector<8x128xf32>, vector<8x128xf32> -> vector<8x128xf32>
    %c0_3 = arith.constant 0 : index
    %c0_4 = arith.constant 0 : index
    %3 = vector.load %arg3[%c0_3, %c0_4] : memref<8x1xf32, #tpu.memory_space<vmem>>, vector<8x1xf32>
    %4 = vector.broadcast %3 : vector<8x1xf32> to vector<8x128xf32>
    %5 = arith.addf %2, %4 : vector<8x128xf32>
    %c0_5 = arith.constant 0 : index
    %c0_6 = arith.constant 0 : index
    %c0_7 = arith.constant 0 : index
    %6 = vector.load %arg4[%c0_5, %c0_6, %c0_7] : memref<5x8x8xf32, #tpu.memory_space<vmem>>, vector<1x8x8xf32>
    %7 = vector.shape_cast %6 : vector<1x8x8xf32> to vector<8x8xf32>
    %cst_8 = arith.constant dense<0.000000e+00> : vector<8x128xf32>
    %8 = tpu.matmul %7, %5, %cst_8 {dimension_numbers = #tpu.dot_dimension_numbers<[1], [0], [0], [1], [0, 0, 1, 1], [], []>} : vector<8x8xf32>, vector<8x128xf32>, vector<8x128xf32> -> vector<8x128xf32>
    %c0_9 = arith.constant 0 : index
    %c0_10 = arith.constant 0 : index
    %c0_11 = arith.constant 0 : index
    %9 = vector.load %arg5[%c0_9, %c0_10, %c0_11] : memref<5x8x1xf32, #tpu.memory_space<vmem>>, vector<1x8x1xf32>
    %10 = vector.shape_cast %9 : vector<1x8x1xf32> to vector<8x1xf32>
    %11 = vector.broadcast %10 : vector<8x1xf32> to vector<8x128xf32>
    %12 = arith.addf %8, %11 : vector<8x128xf32>
    %cst_12 = arith.constant 0.000000e+00 : f32
    %13 = vector.broadcast %cst_12 : f32 to vector<8x128xf32>
    %14 = arith.maximumf %12, %13 : vector<8x128xf32>
    %c1 = arith.constant 1 : index
    %c0_13 = arith.constant 0 : index
    %c0_14 = arith.constant 0 : index
    %15 = vector.load %arg4[%c1, %c0_13, %c0_14] : memref<5x8x8xf32, #tpu.memory_space<vmem>>, vector<1x8x8xf32>
    %16 = vector.shape_cast %15 : vector<1x8x8xf32> to vector<8x8xf32>
    %cst_15 = arith.constant dense<0.000000e+00> : vector<8x128xf32>
    %17 = tpu.matmul %16, %14, %cst_15 {dimension_numbers = #tpu.dot_dimension_numbers<[1], [0], [0], [1], [0, 0, 1, 1], [], []>} : vector<8x8xf32>, vector<8x128xf32>, vector<8x128xf32> -> vector<8x128xf32>
    %c1_16 = arith.constant 1 : index
    %c0_17 = arith.constant 0 : index
    %c0_18 = arith.constant 0 : index
    %18 = vector.load %arg5[%c1_16, %c0_17, %c0_18] : memref<5x8x1xf32, #tpu.memory_space<vmem>>, vector<1x8x1xf32>
    %19 = vector.shape_cast %18 : vector<1x8x1xf32> to vector<8x1xf32>
    %20 = vector.broadcast %19 : vector<8x1xf32> to vector<8x128xf32>
    %21 = arith.addf %17, %20 : vector<8x128xf32>
    %cst_19 = arith.constant 0.000000e+00 : f32
    %22 = vector.broadcast %cst_19 : f32 to vector<8x128xf32>
    %23 = arith.maximumf %21, %22 : vector<8x128xf32>
    %c2 = arith.constant 2 : index
    %c0_20 = arith.constant 0 : index
    %c0_21 = arith.constant 0 : index
    %24 = vector.load %arg4[%c2, %c0_20, %c0_21] : memref<5x8x8xf32, #tpu.memory_space<vmem>>, vector<1x8x8xf32>
    %25 = vector.shape_cast %24 : vector<1x8x8xf32> to vector<8x8xf32>
    %cst_22 = arith.constant dense<0.000000e+00> : vector<8x128xf32>
    %26 = tpu.matmul %25, %23, %cst_22 {dimension_numbers = #tpu.dot_dimension_numbers<[1], [0], [0], [1], [0, 0, 1, 1], [], []>} : vector<8x8xf32>, vector<8x128xf32>, vector<8x128xf32> -> vector<8x128xf32>
    %c2_23 = arith.constant 2 : index
    %c0_24 = arith.constant 0 : index
    %c0_25 = arith.constant 0 : index
    %27 = vector.load %arg5[%c2_23, %c0_24, %c0_25] : memref<5x8x1xf32, #tpu.memory_space<vmem>>, vector<1x8x1xf32>
    %28 = vector.shape_cast %27 : vector<1x8x1xf32> to vector<8x1xf32>
    %29 = vector.broadcast %28 : vector<8x1xf32> to vector<8x128xf32>
    %30 = arith.addf %26, %29 : vector<8x128xf32>
    %cst_26 = arith.constant 0.000000e+00 : f32
    %31 = vector.broadcast %cst_26 : f32 to vector<8x128xf32>
    %32 = arith.maximumf %30, %31 : vector<8x128xf32>
    %c3 = arith.constant 3 : index
    %c0_27 = arith.constant 0 : index
    %c0_28 = arith.constant 0 : index
    %33 = vector.load %arg4[%c3, %c0_27, %c0_28] : memref<5x8x8xf32, #tpu.memory_space<vmem>>, vector<1x8x8xf32>
    %34 = vector.shape_cast %33 : vector<1x8x8xf32> to vector<8x8xf32>
    %cst_29 = arith.constant dense<0.000000e+00> : vector<8x128xf32>
    %35 = tpu.matmul %34, %32, %cst_29 {dimension_numbers = #tpu.dot_dimension_numbers<[1], [0], [0], [1], [0, 0, 1, 1], [], []>} : vector<8x8xf32>, vector<8x128xf32>, vector<8x128xf32> -> vector<8x128xf32>
    %c3_30 = arith.constant 3 : index
    %c0_31 = arith.constant 0 : index
    %c0_32 = arith.constant 0 : index
    %36 = vector.load %arg5[%c3_30, %c0_31, %c0_32] : memref<5x8x1xf32, #tpu.memory_space<vmem>>, vector<1x8x1xf32>
    %37 = vector.shape_cast %36 : vector<1x8x1xf32> to vector<8x1xf32>
    %38 = vector.broadcast %37 : vector<8x1xf32> to vector<8x128xf32>
    %39 = arith.addf %35, %38 : vector<8x128xf32>
    %cst_33 = arith.constant 0.000000e+00 : f32
    %40 = vector.broadcast %cst_33 : f32 to vector<8x128xf32>
    %41 = arith.maximumf %39, %40 : vector<8x128xf32>
    %c4 = arith.constant 4 : index
    %c0_34 = arith.constant 0 : index
    %c0_35 = arith.constant 0 : index
    %42 = vector.load %arg4[%c4, %c0_34, %c0_35] : memref<5x8x8xf32, #tpu.memory_space<vmem>>, vector<1x8x8xf32>
    %43 = vector.shape_cast %42 : vector<1x8x8xf32> to vector<8x8xf32>
    %cst_36 = arith.constant dense<0.000000e+00> : vector<8x128xf32>
    %44 = tpu.matmul %43, %41, %cst_36 {dimension_numbers = #tpu.dot_dimension_numbers<[1], [0], [0], [1], [0, 0, 1, 1], [], []>} : vector<8x8xf32>, vector<8x128xf32>, vector<8x128xf32> -> vector<8x128xf32>
    %c4_37 = arith.constant 4 : index
    %c0_38 = arith.constant 0 : index
    %c0_39 = arith.constant 0 : index
    %45 = vector.load %arg5[%c4_37, %c0_38, %c0_39] : memref<5x8x1xf32, #tpu.memory_space<vmem>>, vector<1x8x1xf32>
    %46 = vector.shape_cast %45 : vector<1x8x1xf32> to vector<8x1xf32>
    %47 = vector.broadcast %46 : vector<8x1xf32> to vector<8x128xf32>
    %48 = arith.addf %44, %47 : vector<8x128xf32>
    %cst_40 = arith.constant 0.000000e+00 : f32
    %49 = vector.broadcast %cst_40 : f32 to vector<8x128xf32>
    %50 = arith.maximumf %48, %49 : vector<8x128xf32>
    %c0_41 = arith.constant 0 : index
    %c0_42 = arith.constant 0 : index
    %51 = vector.load %arg6[%c0_41, %c0_42] : memref<3x8xf32, #tpu.memory_space<vmem>>, vector<3x8xf32>
    %cst_43 = arith.constant dense<0.000000e+00> : vector<3x128xf32>
    %52 = tpu.matmul %51, %50, %cst_43 {dimension_numbers = #tpu.dot_dimension_numbers<[1], [0], [0], [1], [0, 0, 1, 1], [], []>} : vector<3x8xf32>, vector<8x128xf32>, vector<3x128xf32> -> vector<3x128xf32>
    %c0_44 = arith.constant 0 : index
    %c0_45 = arith.constant 0 : index
    %53 = vector.load %arg7[%c0_44, %c0_45] : memref<3x1xf32, #tpu.memory_space<vmem>>, vector<3x1xf32>
    %54 = vector.broadcast %53 : vector<3x1xf32> to vector<3x128xf32>
    %55 = arith.addf %52, %54 : vector<3x128xf32>
    %c0_46 = arith.constant 0 : index
    %c0_47 = arith.constant 0 : index
    %56 = vector.load %arg8[%c0_46, %c0_47] : memref<3x128xf32, #tpu.memory_space<vmem>>, vector<3x128xf32>
    tpu.vector_store %arg8[%c0_46, %c0_47], %55 {strides = array<i32>} : memref<3x128xf32, #tpu.memory_space<vmem>>, vector<3x128xf32>,
    return
  }
  func.func @transform_0(%arg0: i32) -> (i32, i32) {
    %c0_i32 = arith.constant 0 : i32
    %c0_i32_0 = arith.constant 0 : i32
    return %c0_i32, %arg0 : i32, i32
  }
  func.func @transform_1(%arg0: i32) -> (i32, i32) {
    %c0_i32 = arith.constant 0 : i32
    %c0_i32_0 = arith.constant 0 : i32
    %c0_i32_1 = arith.constant 0 : i32
    return %c0_i32, %c0_i32_0 : i32, i32
  }
  func.func @transform_2(%arg0: i32) -> (i32, i32) {
    %c0_i32 = arith.constant 0 : i32
    %c0_i32_0 = arith.constant 0 : i32
    %c0_i32_1 = arith.constant 0 : i32
    return %c0_i32, %c0_i32_0 : i32, i32
  }
  func.func @transform_3(%arg0: i32) -> (i32, i32, i32) {
    %c0_i32 = arith.constant 0 : i32
    %c0_i32_0 = arith.constant 0 : i32
    %c0_i32_1 = arith.constant 0 : i32
    %c0_i32_2 = arith.constant 0 : i32
    return %c0_i32, %c0_i32_0, %c0_i32_1 : i32, i32, i32
  }
  func.func @transform_4(%arg0: i32) -> (i32, i32, i32) {
    %c0_i32 = arith.constant 0 : i32
    %c0_i32_0 = arith.constant 0 : i32
    %c0_i32_1 = arith.constant 0 : i32
    %c0_i32_2 = arith.constant 0 : i32
    return %c0_i32, %c0_i32_0, %c0_i32_1 : i32, i32, i32
  }
  func.func @transform_5(%arg0: i32) -> (i32, i32) {
    %c0_i32 = arith.constant 0 : i32
    %c0_i32_0 = arith.constant 0 : i32
    %c0_i32_1 = arith.constant 0 : i32
    return %c0_i32, %c0_i32_0 : i32, i32
  }
  func.func @transform_6(%arg0: i32) -> (i32, i32) {
    %c0_i32 = arith.constant 0 : i32
    %c0_i32_0 = arith.constant 0 : i32
    %c0_i32_1 = arith.constant 0 : i32
    return %c0_i32, %c0_i32_0 : i32, i32
  }
  func.func @transform_7(%arg0: i32) -> (i32, i32) {
    %c0_i32 = arith.constant 0 : i32
    %c0_i32_0 = arith.constant 0 : i32
    return %c0_i32, %arg0 : i32, i32
  }
}

</mosaic_0001>

<bundles_post_ra>
// kernel: tpu_custom_call.1
= control target key start
LH: loop header
LB: loop body
LE: loop exit
PB: predicated region body
PF: predicated region fallthrough
CT: control target
= control target key end

     0   :  { %vm35_vm0 = vcmask 64512   ;;  %v711_v2 = vmov 0.0   ;;  %vm712_vm1 = vmmov 0   ;;  %v713_v4 = vmov 0   ;;  %s840_s0 = inlined_call_operand.vmem [shape: f32[8,128], index: 0, kind: input, shape index: {}]   ;;  %s841_s1 = inlined_call_operand.vmem [shape: f32[8,8], index: 1, kind: input, shape index: {}]   ;;  %s842_s2 = inlined_call_operand.vmem [shape: f32[8,1], index: 2, kind: input, shape index: {}]   ;;  %s843_s3 = inlined_call_operand.vmem [shape: f32[5,8,8], index: 3, kind: input, shape index: {}]   ;;  %s844_s4 = inlined_call_operand.vmem [shape: f32[5,8,1], index: 4, kind: input, shape index: {}]   ;;  %s845_s5 = inlined_call_operand.vmem [shape: f32[3,8], index: 5, kind: input, shape index: {}]   ;;  %s846_s6 = inlined_call_operand.vmem [shape: f32[3,1], index: 6, kind: input, shape index: {}]   ;;  %s847_s7 = inlined_call_operand.hbm [shape: f32[3,128], index: 7, kind: output, shape index: {}]  }
   0x1   :  { %v28_v0 = vld [vmem:[%s840_s0] sm:$0xff]  ;;  %646 = vmatprep.subr.mxu0 %v711_v2  ;;  %648 = vmatprep.mubr.msk.f32.mxu0 %vm712_vm1, %v711_v2 }
   0x2   :  { %v27_v1 = vld [vmem:[%s841_s1] sm:$0xff]  ;;  %647 = vmatpush3.msra.mxu0 %v28_v0  ;;  %685 = vset.pattern.permute.xlu0 %v713_v4 }
   0x3   :  { %v29_v3 = vld [vmem:[%s842_s2] sm:$0xff] }
   0x4   :  { %12 = vsyncpa [#allocation3], 0  ;;  %649 = vmatmul.mubr.msk.f32.vlgmr.msra.gmra.mrb[0].mxu0 %vm35_vm0, %v27_v1  ;;  %32 = vperm.xlu0 %685, %v29_v3   ;;  %v110_v5 = vld [vmem:[%s844_s4] sm:$0xff]  ;;  %v626_v6 = vld [vmem:[%s844_s4 + $0x18] sm:$0xff]  ;;  %s714_s26 = smov [#allocation2]  }
   0x5   :  { %651 = vmatprep.subr.mxu1 %v711_v2  ;;  %653 = vmatprep.mubr.msk.f32.mxu1 %vm712_vm1, %v711_v2  ;;  %v523_v7 = vld [vmem:[%s846_s6] sm:$0x7]  ;;  %v620_v13 = vld [vmem:[%s844_s4 + $0x8] sm:$0xff]  ;;  %v623_v14 = vld [vmem:[%s844_s4 + $0x10] sm:$0xff]  ;;  %s609_s27 = sshll.u32 %s714_s26, 4  ;;  %s610_s27 = int_to_ptr.vmem [resolvable:$true] %s609_s27 }
   0x6   :  { %656 = vmatprep.subr.mxu0 %v711_v2  ;;  %658 = vmatprep.mubr.msk.f32.mxu0 %vm712_vm1, %v711_v2  ;;  %v109_v12 = vld [vmem:[%s843_s3] sm:$0xff]  ;;  %v619_v21 = vld [vmem:[%s843_s3 + $0x8] sm:$0xff]  ;;  %v622_v27 = vld [vmem:[%s843_s3 + $0x10] sm:$0xff]  ;;  %p692_p1 = scmp.lt.s32.totalorder %s610_s27, %s610_s27 }
   0x7   :  { %686 = vset.pattern.permute.xlu1 %v713_v4  ;;  %v629_v15 = vld [vmem:[%s844_s4 + $0x20] sm:$0xff]  ;;  %v625_v33 = vld [vmem:[%s843_s3 + $0x18] sm:$0xff] }
   0x8   :  { %113 = vperm.xlu0 %685, %v110_v5   ;;  %196 = vperm.xlu1 %686, %v620_v13   ;;  %v628_v39 = vld [vmem:[%s843_s3 + $0x20] sm:$0xff]  ;;  %s687_s3 = scalar_lea.vmem %s610_s27, 64 }
   0x9   :  { %v522_v45 = vld [vmem:[%s845_s5] sm:$0x7]  ;;  %p688_p0 = scmp.ne.s32.totalorder %s610_s27, %s687_s3  ;;  %p693_p2 = scmp.lt.s32.totalorder %s687_s3, %s687_s3 }
   0xb   :  { %p694_p3 = por %p693_p2, %p692_p1 }
   0xc   :  { %362 = vperm.xlu0 %685, %v626_v6   ;;  %279 = vperm.xlu1 %686, %v623_v14  }
   0xd   :  { %p695_p4 = pnand %p694_p3, %p688_p0 }
  0x10   :  { %526 = vperm.xlu0 %685, %v523_v7   ;;  %445 = vperm.xlu1 %686, %v629_v15  }
  0x83   :  { %v33_v8 = vpop.permute.xlu0 %32 }
  0x87   :  { %v114_v16 = vpop.permute.xlu0 %113  ;;  %v197_v22 = vpop.permute.xlu1 %196 }
  0x8b   :  { %v280_v28 = vpop.permute.xlu1 %279  ;;  %v363_v34 = vpop.permute.xlu0 %362 }
  0x8f   :  { %v446_v40 = vpop.permute.xlu1 %445  ;;  %v527_v46 = vpop.permute.xlu0 %526 }
  0xd7   :  { %v105_v9 = vpop.f32.mrb[0].mxu0 }
  0xd8   :  { %v106_v10 = vadd.f32 %v105_v9, %v33_v8  ;;  %v650_v11 = vpop.f32.mrb[1].mxu0 }
  0xda   :  { %652 = vmatpush3.msra.mxu1 %v106_v10 }
  0xdb   :  { %654 = vmatmul.mubr.msk.f32.vlgmr.msra.gmra.mrb[0].mxu1 %vm35_vm0, %v109_v12  ;;  %661 = vmatprep.subr.mxu1 %v711_v2 }
  0xdc   :  { %663 = vmatprep.mubr.msk.f32.mxu1 %vm712_vm1, %v711_v2 }
 0x1ae   :  { %v185_v17 = vpop.f32.mrb[0].mxu1 }
 0x1af   :  { %v186_v18 = vadd.f32 %v185_v17, %v114_v16  ;;  %v655_v19 = vpop.f32.mrb[1].mxu1 }
 0x1b1   :  { %v189_v20 = vmax.f32 %v186_v18, 0.0 }
 0x1b3   :  { %657 = vmatpush3.msra.mxu0 %v189_v20 }
 0x1b4   :  { %659 = vmatmul.mubr.msk.f32.vlgmr.msra.gmra.mrb[2].mxu0 %vm35_vm0, %v619_v21  ;;  %666 = vmatprep.subr.mxu0 %v711_v2 }
 0x1b5   :  { %668 = vmatprep.mubr.msk.f32.mxu0 %vm712_vm1, %v711_v2 }
 0x287   :  { %v268_v23 = vpop.f32.mrb[2].mxu0 }
 0x288   :  { %v269_v24 = vadd.f32 %v268_v23, %v197_v22  ;;  %v660_v25 = vpop.f32.mrb[3].mxu0 }
 0x28a   :  { %v272_v26 = vmax.f32 %v269_v24, 0.0 }
 0x28c   :  { %662 = vmatpush3.msra.mxu1 %v272_v26 }
 0x28d   :  { %664 = vmatmul.mubr.msk.f32.vlgmr.msra.gmra.mrb[2].mxu1 %vm35_vm0, %v622_v27  ;;  %671 = vmatprep.subr.mxu1 %v711_v2 }
 0x28e   :  { %673 = vmatprep.mubr.msk.f32.mxu1 %vm712_vm1, %v711_v2 }
 0x360   :  { %v351_v29 = vpop.f32.mrb[2].mxu1 }
 0x361   :  { %v352_v30 = vadd.f32 %v351_v29, %v280_v28  ;;  %v665_v31 = vpop.f32.mrb[3].mxu1 }
 0x363   :  { %v355_v32 = vmax.f32 %v352_v30, 0.0 }
 0x365   :  { %667 = vmatpush3.msra.mxu0 %v355_v32 }
 0x366   :  { %669 = vmatmul.mubr.msk.f32.vlgmr.msra.gmra.mrb[4].mxu0 %vm35_vm0, %v625_v33  ;;  %676 = vmatprep.subr.mxu0 %v711_v2 }
 0x367   :  { %678 = vmatprep.mubr.msk.f32.mxu0 %vm712_vm1, %v711_v2 }
 0x439   :  { %v434_v35 = vpop.f32.mrb[4].mxu0 }
 0x43a   :  { %v435_v36 = vadd.f32 %v434_v35, %v363_v34  ;;  %v670_v37 = vpop.f32.mrb[5].mxu0 }
 0x43c   :  { %v438_v38 = vmax.f32 %v435_v36, 0.0 }
 0x43e   :  { %672 = vmatpush3.msra.mxu1 %v438_v38 }
 0x43f   :  { %674 = vmatmul.mubr.msk.f32.vlgmr.msra.gmra.mrb[4].mxu1 %vm35_vm0, %v628_v39 }
 0x512   :  { %v517_v41 = vpop.f32.mrb[4].mxu1 }
 0x513   :  { %v518_v42 = vadd.f32 %v517_v41, %v446_v40  ;;  %v675_v43 = vpop.f32.mrb[5].mxu1 }
 0x515   :  { %v521_v44 = vmax.f32 %v518_v42, 0.0 }
 0x517   :  { %677 = vmatpush3.msra.mxu0 %v521_v44 }
 0x518   :  { %679 = vmatmul.mubr.msk.f32.vlgmr.msra.gmra.mrb[6].mxu0 %vm35_vm0, %v522_v45 }
 0x5eb   :  { %v598_v47 = vpop.f32.mrb[6].mxu0 }
 0x5ec   :  { %v599_v48 = vadd.f32 %v598_v47, %v527_v46  ;;  %v680_v49 = vpop.f32.mrb[7].mxu0 }
 0x5ee   :  { %602 = vst [vmem:[#allocation2] sm:$0x7] %v599_v48 }
 0x5ef   :  { %698 = shalt.err (!%p695_p4)
}
 0x5f0   :  { %s699_s29 = scalar_lea.hbm %s847_s7, 64 }
 0x5f1   :  { %p700_p5 = scmp.ne.s32.totalorder %s847_s7, %s699_s29  ;;  %p703_p6 = scmp.lt.u32.totalorder %s699_s29, %s847_s7 }
 0x5f3   :  { %p705_p7 = pnand %p703_p6, %p700_p5 }
 0x5f5   :  { %708 = shalt.err (!%p705_p7)
}
 0x5f6   :  { %612 = dma.vmem_to_hbm [thread:$0]  %s610_s27, 64, %s847_s7, [#allocation3]  }
 0x5f7   :  { %709 = dma.done.wait [#allocation3], 64  }
 0x5f8   :  { %710 = vsyncadd [#allocation3], 4294967232 }
 0x5f9   :  { %616 = vsyncpa [#allocation3], 1 }

</bundles_post_ra>
